<compile_context>
chip_gen: v7x
topology: tpu7x:2x2x1
jax: 0.10.0
libtpu: 0.0.40
codegen_flags: <defaults>
</compile_context>

<pallas_src>
import functools

import jax
import jax.numpy as jnp
from jax import lax
from jax.experimental import pallas as pl
from jax.experimental.pallas import tpu as pltpu

_LANE = 128
_SUBLANE = 8
# ~1.5 MiB per input tile -> 3 inputs x 2 pipeline buffers ~= 9 MiB of VMEM.
_TILE_BYTES_BUDGET = 3 * (1 << 19)


def _circle_triple_loss_kernel(a_ref, p_ref, n_ref, out_ref, acc_ref, *,
                               m, gamma, batch, tile_rows, reduce_axis,
                               mask_rows):
    """One (slab, batch-tile) grid step.

    reduce_axis == 0: refs are (D, TB)  -- batch on lanes    (D < 128 path)
    reduce_axis == 1: refs are (TB, D)  -- batch on sublanes (D >= 128 path)
    """
    i = pl.program_id(1)

    @pl.when(i == 0)
    def _init():
        acc_ref[...] = jnp.zeros_like(acc_ref)

    # Load `a` once, reuse it for both distance computations.
    a = a_ref[...].astype(jnp.float32)
    p = p_ref[...].astype(jnp.float32)
    n = n_ref[...].astype(jnp.float32)

    # torch.pairwise_distance(x1, x2, p=2, eps=1e-6) == ||x1 - x2 + eps||_2
    eps = 1e-6
    dp = a - p + eps
    dn = a - n + eps
    d_ap = jnp.sqrt(jnp.sum(dp * dp, axis=reduce_axis, keepdims=True))
    d_an = jnp.sqrt(jnp.sum(dn * dn, axis=reduce_axis, keepdims=True))

    ap = jnp.maximum(-d_ap + m, 0.0)      # clamp_min(-d_ap + m, 0)
    an = jnp.maximum(d_an + m, 0.0)       # clamp_min( d_an + m, 0)
    delta_p = 1.0 - m
    delta_n = m
    logit_p = -ap * (d_ap - delta_p) * gamma
    logit_n = an * (d_an - delta_n) * gamma
    x = jnp.maximum(logit_n - logit_p, 0.0)

    # nn.Softplus(beta=1, threshold=20): linear above the threshold.
    sp = jnp.where(x > 20.0, x, jnp.log1p(jnp.exp(jnp.minimum(x, 20.0))))

    if mask_rows:
        # Last tile may run past the batch; zero out padded rows so the mean
        # (divide by the true B in the wrapper) stays unbiased.
        batch_axis = 1 - reduce_axis
        row = lax.broadcasted_iota(jnp.int32, sp.shape, batch_axis)
        tile_idx = pl.program_id(0) * pl.num_programs(1) + i
        valid = (tile_idx * tile_rows + row) < batch
        sp = jnp.where(valid, sp, 0.0)

    acc_ref[...] += jnp.sum(sp, keepdims=True)

    @pl.when(i == pl.num_programs(1) - 1)
    def _finalize():
        out_ref[0] = acc_ref[...]


def _choose_batch_tile(batch, feat, quantum, max_rows=None):
    """Largest batch tile (multiple of `quantum`) that fits the VMEM budget."""
    budget_rows = max(quantum, _TILE_BYTES_BUDGET // (4 * feat))
    if max_rows is not None:
        budget_rows = min(budget_rows, max(quantum, max_rows))
    if batch <= budget_rows:
        return batch                      # one block spans the whole batch dim
    return max(quantum, (budget_rows // quantum) * quantum)


def circle_triple_loss(anchor, positive, negative, *, m=0.25, gamma=64.0,
                       max_tile_rows=None):
    assert anchor.shape == positive.shape == negative.shape
    assert anchor.ndim == 2
    B, D = anchor.shape

    lane_dense = D < _LANE
    if lane_dense:
        # D < 128: put the batch on the 128-lane axis so every vreg is full.
        a, p, n = anchor.T, positive.T, negative.T          # (D, B)
        tb = _choose_batch_tile(B, D, _LANE, max_tile_rows)
        reduce_axis = 0
        in_block = (D, tb)
    else:
        a, p, n = anchor, positive, negative                # (B, D)
        tb = _choose_batch_tile(B, D, _SUBLANE, max_tile_rows)
        reduce_axis = 1
        in_block = (tb, D)

    total_tiles = pl.cdiv(B, tb)
    # v7x megacore: split the batch tiles into 2 independent slabs when even.
    num_slabs = 2 if (total_tiles >= 2 and total_tiles % 2 == 0) else 1
    tiles_per_slab = total_tiles // num_slabs

    if lane_dense:
        def in_map(s, i):
            return (0, s * tiles_per_slab + i)
    else:
        def in_map(s, i):
            return (s * tiles_per_slab + i, 0)

    kernel = functools.partial(
        _circle_triple_loss_kernel,
        m=float(m), gamma=float(gamma), batch=B, tile_rows=tb,
        reduce_axis=reduce_axis, mask_rows=(B % tb != 0))

    out = pl.pallas_call(
        kernel,
        out_shape=jax.ShapeDtypeStruct((num_slabs, 1, 1), jnp.float32),
        grid_spec=pltpu.PrefetchScalarGridSpec(
            num_scalar_prefetch=0,
            grid=(num_slabs, tiles_per_slab),
            in_specs=[pl.BlockSpec(in_block, in_map)] * 3,
            out_specs=pl.BlockSpec((1, 1, 1), lambda s, i: (s, 0, 0)),
            scratch_shapes=[pltpu.VMEM((1, 1), jnp.float32)],
        ),
        compiler_params=pltpu.CompilerParams(
            dimension_semantics=("parallel", "arbitrary")),
        cost_estimate=pl.CostEstimate(
            flops=6 * B * D + 16 * B,
            transcendentals=4 * B,
            bytes_accessed=3 * B * D * 4 + num_slabs * 4),
    )(a, p, n)

    # Per-slab partial sums -> mean over the true batch size.
    return jnp.sum(out[:, 0, 0]) / B


def _reference(anchor, positive, negative, m, gamma):
    eps = 1e-6
    d_ap = jnp.sqrt(jnp.sum((anchor - positive + eps) ** 2, axis=-1))
    d_an = jnp.sqrt(jnp.sum((anchor - negative + eps) ** 2, axis=-1))
    ap = jnp.maximum(-d_ap + m, 0.0)
    an = jnp.maximum(d_an + m, 0.0)
    logit_p = -ap * (d_ap - (1.0 - m)) * gamma
    logit_n = an * (d_an - m) * gamma
    x = jnp.maximum(logit_n - logit_p, 0.0)
    sp = jnp.where(x > 20.0, x, jnp.log1p(jnp.exp(jnp.minimum(x, 20.0))))
    return jnp.mean(sp)


if __name__ == "__main__":
    # Deterministic small example: batch=8 triplets of 32-dim embeddings.
    key = jax.random.PRNGKey(0)
    k_a, k_p, k_n = jax.random.split(key, 3)
    B, D = 8, 32
    anchor = jax.random.normal(k_a, (B, D), dtype=jnp.float32)
    positive = jax.random.normal(k_p, (B, D), dtype=jnp.float32)
    negative = jax.random.normal(k_n, (B, D), dtype=jnp.float32)

    loss = circle_triple_loss(anchor, positive, negative, m=0.25, gamma=64.0)
    jax.block_until_ready(loss)
    ref = _reference(anchor, positive, negative, 0.25, 64.0)
    assert jnp.allclose(loss, ref, rtol=1e-5, atol=1e-5), (loss, ref)

    # Exercise the tiled / masked / multi-slab paths with forced small tiles.
    for tb_cap, (Bt, Dt) in ((128, (200, 32)), (16, (72, 256))):
        ka, kp, kn = jax.random.split(jax.random.PRNGKey(1), 3)
        a2 = jax.random.normal(ka, (Bt, Dt), dtype=jnp.float32)
        p2 = jax.random.normal(kp, (Bt, Dt), dtype=jnp.float32)
        n2 = jax.random.normal(kn, (Bt, Dt), dtype=jnp.float32)
        l2 = circle_triple_loss(a2, p2, n2, m=0.25, gamma=64.0,
                                max_tile_rows=tb_cap)
        jax.block_until_ready(l2)
        r2 = _reference(a2, p2, n2, 0.25, 64.0)
        assert jnp.allclose(l2, r2, rtol=1e-5, atol=1e-5), ((Bt, Dt), l2, r2)

    print("KERNEL_OK")
</pallas_src>

<mosaic_0001>
module attributes {stable_mosaic.version = 11 : i64} {
  func.func @_circle_triple_loss_kernel(%arg0: i32, %arg1: i32, %arg2: memref<32x8xf32, #tpu.memory_space<vmem>>, %arg3: memref<32x8xf32, #tpu.memory_space<vmem>>, %arg4: memref<32x8xf32, #tpu.memory_space<vmem>>, %arg5: memref<1x1x1xf32, #tpu.memory_space<vmem>>, %arg6: memref<1x1xf32, #tpu.memory_space<vmem>>) attributes {dimension_semantics = [#tpu.dimension_semantics<parallel>, #tpu.dimension_semantics<arbitrary>], iteration_bounds = array<i64: 1, 1>, scalar_prefetch = 0 : i64, scratch_operands = 1 : i64, tpu.core_type = #tpu.core_type<tc>, window_params = [{transform_indices = @transform_0, window_bounds = array<i64: 32, 8>}, {transform_indices = @transform_1, window_bounds = array<i64: 32, 8>}, {transform_indices = @transform_2, window_bounds = array<i64: 32, 8>}, {transform_indices = @transform_3, window_bounds = array<i64: 1, 1, 1>}]} {
    %c0_i32 = arith.constant 0 : i32
    %0 = arith.cmpi eq, %arg1, %c0_i32 : i32
    %1 = arith.extui %0 : i1 to i32
    %c0_i32_0 = arith.constant 0 : i32
    %2 = arith.cmpi ne, %1, %c0_i32_0 : i32
    scf.if %2 {
      %cst_29 = arith.constant 0.000000e+00 : f32
      %63 = vector.broadcast %cst_29 : f32 to vector<1x1xf32>
      %c0_30 = arith.constant 0 : index
      %c0_31 = arith.constant 0 : index
      %64 = vector.load %arg6[%c0_30, %c0_31] : memref<1x1xf32, #tpu.memory_space<vmem>>, vector<1x1xf32>
      tpu.vector_store %arg6[%c0_30, %c0_31], %63 {strides = array<i32>} : memref<1x1xf32, #tpu.memory_space<vmem>>, vector<1x1xf32>,
    } else {
    }
    %c0 = arith.constant 0 : index
    %c0_1 = arith.constant 0 : index
    %3 = vector.load %arg2[%c0, %c0_1] : memref<32x8xf32, #tpu.memory_space<vmem>>, vector<32x8xf32>
    %c0_2 = arith.constant 0 : index
    %c0_3 = arith.constant 0 : index
    %4 = vector.load %arg3[%c0_2, %c0_3] : memref<32x8xf32, #tpu.memory_space<vmem>>, vector<32x8xf32>
    %c0_4 = arith.constant 0 : index
    %c0_5 = arith.constant 0 : index
    %5 = vector.load %arg4[%c0_4, %c0_5] : memref<32x8xf32, #tpu.memory_space<vmem>>, vector<32x8xf32>
    %6 = arith.subf %3, %4 : vector<32x8xf32>
    %cst = arith.constant 9.99999997E-7 : f32
    %7 = vector.broadcast %cst : f32 to vector<32x8xf32>
    %8 = arith.addf %6, %7 : vector<32x8xf32>
    %9 = arith.subf %3, %5 : vector<32x8xf32>
    %cst_6 = arith.constant 9.99999997E-7 : f32
    %10 = vector.broadcast %cst_6 : f32 to vector<32x8xf32>
    %11 = arith.addf %9, %10 : vector<32x8xf32>
    %12 = arith.mulf %8, %8 : vector<32x8xf32>
    %cst_7 = arith.constant dense<0.000000e+00> : vector<8xf32>
    %13 = vector.multi_reduction <add>, %12, %cst_7 [0] : vector<32x8xf32> to vector<8xf32>
    %14 = vector.shape_cast %13 : vector<8xf32> to vector<1x8xf32>
    %15 = math.sqrt %14 : vector<1x8xf32>
    %16 = arith.mulf %11, %11 : vector<32x8xf32>
    %cst_8 = arith.constant dense<0.000000e+00> : vector<8xf32>
    %17 = vector.multi_reduction <add>, %16, %cst_8 [0] : vector<32x8xf32> to vector<8xf32>
    %18 = vector.shape_cast %17 : vector<8xf32> to vector<1x8xf32>
    %19 = math.sqrt %18 : vector<1x8xf32>
    %cst_9 = arith.constant 0.000000e+00 : f32
    %20 = vector.broadcast %cst_9 : f32 to vector<1x8xf32>
    %21 = arith.subf %20, %15 : vector<1x8xf32>
    %cst_10 = arith.constant 2.500000e-01 : f32
    %22 = vector.broadcast %cst_10 : f32 to vector<1x8xf32>
    %23 = arith.addf %21, %22 : vector<1x8xf32>
    %cst_11 = arith.constant 0.000000e+00 : f32
    %24 = vector.broadcast %cst_11 : f32 to vector<1x8xf32>
    %25 = arith.maximumf %23, %24 : vector<1x8xf32>
    %cst_12 = arith.constant 2.500000e-01 : f32
    %26 = vector.broadcast %cst_12 : f32 to vector<1x8xf32>
    %27 = arith.addf %19, %26 : vector<1x8xf32>
    %cst_13 = arith.constant 0.000000e+00 : f32
    %28 = vector.broadcast %cst_13 : f32 to vector<1x8xf32>
    %29 = arith.maximumf %27, %28 : vector<1x8xf32>
    %cst_14 = arith.constant 0.000000e+00 : f32
    %30 = vector.broadcast %cst_14 : f32 to vector<1x8xf32>
    %31 = arith.subf %30, %25 : vector<1x8xf32>
    %cst_15 = arith.constant 7.500000e-01 : f32
    %32 = vector.broadcast %cst_15 : f32 to vector<1x8xf32>
    %33 = arith.subf %15, %32 : vector<1x8xf32>
    %34 = arith.mulf %31, %33 : vector<1x8xf32>
    %cst_16 = arith.constant 6.400000e+01 : f32
    %35 = vector.broadcast %cst_16 : f32 to vector<1x8xf32>
    %36 = arith.mulf %34, %35 : vector<1x8xf32>
    %cst_17 = arith.constant 2.500000e-01 : f32
    %37 = vector.broadcast %cst_17 : f32 to vector<1x8xf32>
    %38 = arith.subf %19, %37 : vector<1x8xf32>
    %39 = arith.mulf %29, %38 : vector<1x8xf32>
    %cst_18 = arith.constant 6.400000e+01 : f32
    %40 = vector.broadcast %cst_18 : f32 to vector<1x8xf32>
    %41 = arith.mulf %39, %40 : vector<1x8xf32>
    %42 = arith.subf %41, %36 : vector<1x8xf32>
    %cst_19 = arith.constant 0.000000e+00 : f32
    %43 = vector.broadcast %cst_19 : f32 to vector<1x8xf32>
    %44 = arith.maximumf %42, %43 : vector<1x8xf32>
    %cst_20 = arith.constant 2.000000e+01 : f32
    %45 = vector.broadcast %cst_20 : f32 to vector<1x8xf32>
    %46 = arith.cmpf ogt, %44, %45 : vector<1x8xf32>
    %cst_21 = arith.constant 2.000000e+01 : f32
    %47 = vector.broadcast %cst_21 : f32 to vector<1x8xf32>
    %48 = arith.minimumf %44, %47 : vector<1x8xf32>
    %49 = math.exp %48 : vector<1x8xf32>
    %50 = math.log1p %49 : vector<1x8xf32>
    %51 = arith.select %46, %44, %50 : vector<1x8xi1>, vector<1x8xf32>
    %c0_22 = arith.constant 0 : index
    %c0_23 = arith.constant 0 : index
    %52 = vector.load %arg6[%c0_22, %c0_23] : memref<1x1xf32, #tpu.memory_space<vmem>>, vector<1x1xf32>
    %53 = vector.shape_cast %51 : vector<1x8xf32> to vector<1x1x8xf32>
    %cst_24 = arith.constant dense<0.000000e+00> : vector<1xf32>
    %54 = vector.multi_reduction <add>, %53, %cst_24 [1, 2] : vector<1x1x8xf32> to vector<1xf32>
    %55 = vector.shape_cast %54 : vector<1xf32> to vector<1x1x1xf32>
    %56 = vector.extract %55[0, 0, 0] : f32 from vector<1x1x1xf32>
    %57 = vector.broadcast %56 : f32 to vector<1x1xf32>
    %58 = arith.addf %52, %57 : vector<1x1xf32>
    %c0_25 = arith.constant 0 : index
    %c0_26 = arith.constant 0 : index
    %59 = vector.load %arg6[%c0_25, %c0_26] : memref<1x1xf32, #tpu.memory_space<vmem>>, vector<1x1xf32>
    tpu.vector_store %arg6[%c0_25, %c0_26], %58 {strides = array<i32>} : memref<1x1xf32, #tpu.memory_space<vmem>>, vector<1x1xf32>,
    %c0_i32_27 = arith.constant 0 : i32
    %60 = arith.cmpi eq, %arg1, %c0_i32_27 : i32
    %61 = arith.extui %60 : i1 to i32
    %c0_i32_28 = arith.constant 0 : i32
    %62 = arith.cmpi ne, %61, %c0_i32_28 : i32
    scf.if %62 {
      %c0_29 = arith.constant 0 : index
      %c0_30 = arith.constant 0 : index
      %63 = vector.load %arg6[%c0_29, %c0_30] : memref<1x1xf32, #tpu.memory_space<vmem>>, vector<1x1xf32>
      %c0_31 = arith.constant 0 : index
      %c0_32 = arith.constant 0 : index
      %c0_33 = arith.constant 0 : index
      %64 = vector.load %arg5[%c0_31, %c0_32, %c0_33] : memref<1x1x1xf32, #tpu.memory_space<vmem>>, vector<1x1x1xf32>
      %65 = vector.shape_cast %64 : vector<1x1x1xf32> to vector<1x1xf32>
      %66 = vector.shape_cast %63 : vector<1x1xf32> to vector<1x1x1xf32>
      tpu.vector_store %arg5[%c0_31, %c0_32, %c0_33], %66 {strides = array<i32>} : memref<1x1x1xf32, #tpu.memory_space<vmem>>, vector<1x1x1xf32>,
    } else {
    }
    return
  }
  func.func @transform_0(%arg0: i32, %arg1: i32) -> (i32, i32) {
    %c1_i32 = arith.constant 1 : i32
    %0 = arith.muli %arg0, %c1_i32 : i32
    %1 = arith.addi %0, %arg1 : i32
    %c0_i32 = arith.constant 0 : i32
    %c0_i32_0 = arith.constant 0 : i32
    return %c0_i32, %1 : i32, i32
  }
  func.func @transform_1(%arg0: i32, %arg1: i32) -> (i32, i32) {
    %c1_i32 = arith.constant 1 : i32
    %0 = arith.muli %arg0, %c1_i32 : i32
    %1 = arith.addi %0, %arg1 : i32
    %c0_i32 = arith.constant 0 : i32
    %c0_i32_0 = arith.constant 0 : i32
    return %c0_i32, %1 : i32, i32
  }
  func.func @transform_2(%arg0: i32, %arg1: i32) -> (i32, i32) {
    %c1_i32 = arith.constant 1 : i32
    %0 = arith.muli %arg0, %c1_i32 : i32
    %1 = arith.addi %0, %arg1 : i32
    %c0_i32 = arith.constant 0 : i32
    %c0_i32_0 = arith.constant 0 : i32
    return %c0_i32, %1 : i32, i32
  }
  func.func @transform_3(%arg0: i32, %arg1: i32) -> (i32, i32, i32) {
    %c0_i32 = arith.constant 0 : i32
    %c0_i32_0 = arith.constant 0 : i32
    %c0_i32_1 = arith.constant 0 : i32
    return %arg0, %c0_i32, %c0_i32_0 : i32, i32, i32
  }
}

</mosaic_0001>

<bundles_post_ra>
// kernel: tpu_custom_call.1
= control target key start
LH: loop header
LB: loop body
LE: loop exit
PB: predicated region body
PF: predicated region fallthrough
CT: control target
= control target key end

     0   :  { %vm104_vm0 = vcmask 64512   ;;  %s349_s0 = inlined_call_operand.vmem [shape: f32[32,8], index: 0, kind: input, shape index: {}]   ;;  %s350_s1 = inlined_call_operand.vmem [shape: f32[32,8], index: 1, kind: input, shape index: {}]   ;;  %s351_s2 = inlined_call_operand.vmem [shape: f32[32,8], index: 2, kind: input, shape index: {}]   ;;  %s352_s3 = inlined_call_operand.hbm [shape: f32[1,1,1], index: 3, kind: output, shape index: {}]  }
   0x1   :  { %v72_v0 = vld [vmem:[%s349_s0] sm:$0xff]  ;;  %v73_v1 = vld [vmem:[%s349_s0 + $0x8] sm:$0xff]  ;;  %v74_v2 = vld [vmem:[%s349_s0 + $0x10] sm:$0xff] }
   0x2   :  { %v75_v3 = vld [vmem:[%s349_s0 + $0x18] sm:$0xff]  ;;  %v76_v4 = vld [vmem:[%s350_s1] sm:$0xff]  ;;  %v77_v5 = vld [vmem:[%s350_s1 + $0x8] sm:$0xff] }
   0x3   :  { %v78_v6 = vld [vmem:[%s350_s1 + $0x10] sm:$0xff]  ;;  %v79_v7 = vld [vmem:[%s350_s1 + $0x18] sm:$0xff]  ;;  %v80_v8 = vld [vmem:[%s351_s2] sm:$0xff]  ;;  %v84_v9 = vsub.f32 %v72_v0, %v76_v4  ;;  %v85_v10 = vsub.f32 %v73_v1, %v77_v5 }
   0x4   :  { %v81_v11 = vld [vmem:[%s351_s2 + $0x8] sm:$0xff]  ;;  %v82_v12 = vld [vmem:[%s351_s2 + $0x10] sm:$0xff]  ;;  %v83_v13 = vld [vmem:[%s351_s2 + $0x18] sm:$0xff]  ;;  %v86_v14 = vsub.f32 %v74_v2, %v78_v6  ;;  %v87_v15 = vsub.f32 %v75_v3, %v79_v7  ;;  %v92_v16 = vsub.f32 %v72_v0, %v80_v8 }
   0x5   :  { %v88_v17 = vadd.f32 1e-06, %v84_v9  ;;  %v89_v18 = vadd.f32 1e-06, %v85_v10  ;;  %v93_v19 = vsub.f32 %v73_v1, %v81_v11  ;;  %v94_v20 = vsub.f32 %v74_v2, %v82_v12 }
   0x6   :  { %8 = vsyncpa [#allocation4], 0  ;;  %v90_v21 = vadd.f32 1e-06, %v86_v14  ;;  %v91_v22 = vadd.f32 1e-06, %v87_v15  ;;  %v95_v23 = vsub.f32 %v75_v3, %v83_v13 }
   0x7   :  { %v96_v24 = vadd.f32 1e-06, %v92_v16  ;;  %v97_v25 = vadd.f32 1e-06, %v93_v19  ;;  %v98_v26 = vadd.f32 1e-06, %v94_v20  ;;  %v100_v27 = vmul.f32 %v88_v17, %v88_v17 }
   0x8   :  { %v101_v28 = vmul.f32 %v89_v18, %v89_v18  ;;  %v99_v29 = vadd.f32 1e-06, %v95_v23  ;;  %v102_v30 = vmul.f32 %v90_v21, %v90_v21  ;;  %v103_v31 = vmul.f32 %v91_v22, %v91_v22  ;;  %s269_s2 = smov [#allocation3]  }
   0x9   :  { %v125_v32 = vmul.f32 %v96_v24, %v96_v24  ;;  %v105_v33 = vsel %vm104_vm0, %v100_v27, 0.0  ;;  %v126_v35 = vmul.f32 %v97_v25, %v97_v25  ;;  %v127_v36 = vmul.f32 %v98_v26, %v98_v26  ;;  %s204_s8 = sshll.u32 %s269_s2, 4  ;;  %s205_s8 = int_to_ptr.vmem [resolvable:$true] %s204_s8 }
   0xa   :  { %v106_v34 = vsel %vm104_vm0, %v101_v28, 0.0  ;;  %v108_v38 = vsel %vm104_vm0, %v102_v30, 0.0  ;;  %v128_v39 = vmul.f32 %v99_v29, %v99_v29  ;;  %v110_v40 = vsel %vm104_vm0, %v103_v31, 0.0  ;;  %s244_s9 = scalar_lea.vmem %s205_s8, 16  ;;  %s248_s10 = scalar_lea.vmem %s205_s8, 32 }
   0xb   :  { %v107_v37 = vadd.f32 %v106_v34, %v105_v33  ;;  %v129_v41 = vsel %vm104_vm0, %v125_v32, 0.0  ;;  %v130_v42 = vsel %vm104_vm0, %v126_v35, 0.0  ;;  %v132_v43 = vsel %vm104_vm0, %v127_v36, 0.0  ;;  %p245_p0 = scmp.ne.s32.totalorder %s205_s8, %s244_s9  ;;  %p249_p1 = scmp.lt.s32.totalorder %s205_s8, %s205_s8 }
   0xc   :  { %v131_v45 = vadd.f32 %v130_v42, %v129_v41  ;;  %v134_v46 = vsel %vm104_vm0, %v128_v39, 0.0  ;;  %vm178_vm7 = vcmask 57344   ;;  %vm70_vm8 = vcmask 0   ;;  %p250_p2 = scmp.lt.s32.totalorder %s248_s10, %s244_s9 }
   0xd   :  { %v109_v44 = vadd.f32 %v108_v38, %v107_v37  ;;  %v268_v35 = vmov 0.0  }
   0xe   :  { %v133_v48 = vadd.f32 %v132_v43, %v131_v45  ;;  %71 = vst.msk [vmem:[#allocation2] sm:$0x1] %vm70_vm8, %v268_v35  ;;  %p251_p3 = por %p250_p2, %p249_p1 }
   0xf   :  { %v111_v47 = vadd.f32 %v110_v40, %v109_v44 }
  0x10   :  { %v135_v50 = vadd.f32 %v134_v46, %v133_v48  ;;  %p252_p4 = pnand %p251_p3, %p245_p0 }
  0x11   :  { %v112_v49 = vrot.slane %v111_v47, 4 }
  0x12   :  { %v136_v52 = vrot.slane %v135_v50, 4 }
  0x13   :  { %v113_v51 = vadd.f32 %v112_v49, %v111_v47 }
  0x14   :  { %v137_v54 = vadd.f32 %v136_v52, %v135_v50 }
  0x15   :  { %v114_v53 = vrot.slane %v113_v51, 2  ;;  %v177_v43 = vld [vmem:[#allocation2] sm:$0x1] }
  0x16   :  { %v138_v56 = vrot.slane %v137_v54, 2 }
  0x17   :  { %v115_v55 = vadd.f32 %v114_v53, %v113_v51 }
  0x18   :  { %v139_v58 = vadd.f32 %v138_v56, %v137_v54 }
  0x19   :  { %v116_v57 = vrot.slane %v115_v55, 1 }
  0x1a   :  { %v140_v60 = vrot.slane %v139_v58, 1 }
  0x1b   :  { %v117_v59 = vadd.f32 %v116_v57, %v115_v55 }
  0x1c   :  { %v141_v61 = vadd.f32 %v140_v60, %v139_v58 }
  0x1d   :  { %236 = vrsqrt.f32 %v117_v59  ;;  %vm120_vm1 = vcmp.eq.f32.partialorder %v117_v59, inf  ;;  %v123_v63 = vand.u32 2147483648, %v117_v59  ;;  %vm122_vm2 = vcmp.eq.f32.partialorder %v117_v59, 0.0 }
  0x1e   :  { %238 = vrsqrt.f32 %v141_v61  ;;  %vm144_vm3 = vcmp.eq.f32.partialorder %v141_v61, inf  ;;  %v147_v3 = vand.u32 2147483648, %v141_v61  ;;  %vm146_vm4 = vcmp.eq.f32.partialorder %v141_v61, 0.0 }
  0x27   :  { %v237_v62 = vpop.eup %236 }
  0x28   :  { %v119_v0 = vmul.f32 %v237_v62, %v117_v59  ;;  %v239_v1 = vpop.eup %238 }
  0x29   :  { %v143_v5 = vmul.f32 %v239_v1, %v141_v61 }
  0x2a   :  { %v121_v2 = vsel %vm120_vm1, %v117_v59, %v119_v0 }
  0x2b   :  { %v124_v4 = vsel %vm122_vm2, %v123_v63, %v121_v2  ;;  %v145_v7 = vsel %vm144_vm3, %v141_v61, %v143_v5 }
  0x2c   :  { %v149_v6 = vsub.f32 0.0, %v124_v4  ;;  %v148_v8 = vsel %vm146_vm4, %v147_v3, %v145_v7  ;;  %v230_v13 = vadd.f32 -0.75, %v124_v4 }
  0x2d   :  { %v152_v10 = vadd.f32 0.25, %v148_v8  ;;  %v231_v11 = vadd.f32 -0.25, %v148_v8 }
  0x2e   :  { %v150_v9 = vadd.f32 0.25, %v149_v6 }
  0x2f   :  { %v153_v14 = vmax.f32 %v152_v10, 0.0 }
  0x30   :  { %v151_v12 = vmax.f32 %v150_v9, 0.0 }
  0x31   :  { %v159_v16 = vmul.f32 %v231_v11, %v153_v14 }
  0x32   :  { %v154_v15 = vsub.f32 0.0, %v151_v12 }
  0x33   :  { %v160_v18 = vmul.f32 64.0, %v159_v16 }
  0x34   :  { %v156_v17 = vmul.f32 %v230_v13, %v154_v15 }
  0x36   :  { %v157_v19 = vmul.f32 64.0, %v156_v17 }
  0x38   :  { %v161_v20 = vsub.f32 %v160_v18, %v157_v19 }
  0x3a   :  { %v162_v21 = vmax.f32 %v161_v20, 0.0 }
  0x3c   :  { %v164_v22 = vmin.f32 %v162_v21, 20.0  ;;  %vm163_vm6 = vcmp.gt.f32.partialorder %v162_v21, 20.0 }
  0x3e   :  { %v165_v23 = vmul.f32 1.442695, %v164_v22 }
  0x40   :  { %240 = vpow2.f32 %v165_v23 }
  0x4a   :  { %v241_v24 = vpop.eup %240 }
  0x4b   :  { %v167_v25 = vadd.f32 1.0, %v241_v24  ;;  %v170_v26 = vmul.f32 -0.5, %v241_v24  ;;  %v173_v28 = vand.u32 2147483647, %v241_v24 }
  0x4d   :  { %242 = vlog2.f32 %v167_v25  ;;  %v171_v27 = vadd.f32 1.0, %v170_v26  ;;  %vm174_vm5 = vcmp.lt.f32.partialorder %v173_v28, 0.0004427343 }
  0x4f   :  { %v172_v29 = vmul.f32 %v241_v24, %v171_v27 }
  0x57   :  { %v243_v30 = vpop.eup %242 }
  0x58   :  { %v169_v31 = vmul.f32 0.6931472, %v243_v30 }
  0x5a   :  { %v175_v32 = vsel %vm174_vm5, %v172_v29, %v169_v31 }
  0x5b   :  { %v176_v33 = vsel %vm163_vm6, %v162_v21, %v175_v32 }
  0x5c   :  { %v179_v34 = vsel %vm178_vm7, %v176_v33, 0.0 }
  0x5d   :  { %180 = vadd.xlane.f32.xlu0 %v179_v34 }
  0xea   :  { %v181_v36 = vpop.xlane.xlu0 %180 }
  0xeb   :  { %v182_v37 = vrot.slane %v181_v36, 4 }
  0xed   :  { %v183_v38 = vadd.f32 %v182_v37, %v181_v36 }
  0xef   :  { %v184_v39 = vrot.slane %v183_v38, 2 }
  0xf1   :  { %v185_v40 = vadd.f32 %v184_v39, %v183_v38 }
  0xf3   :  { %v186_v41 = vrot.slane %v185_v40, 1 }
  0xf5   :  { %v187_v42 = vadd.f32 %v186_v41, %v185_v40 }
  0xf7   :  { %232 = vpush %v187_v42 }
 0x128   :  { %s233_s1 = spop %232 }
 0x129   :  { %v189_v44 = vstv %s233_s1 }
 0x12a   :  { %v190_v45 = vadd.f32 %v189_v44, %v177_v43 }
 0x12c   :  { %192 = vst.msk [vmem:[#allocation2] sm:$0x1] %vm70_vm8, %v190_v45 }
 0x133   :  { %v196_v46 = vld [vmem:[#allocation2] sm:$0x1] }
 0x134   :  { %197 = vst.msk [vmem:[#allocation3] sm:$0x1] %vm70_vm8, %v196_v46 }
 0x135   :  { %255 = shalt.err (!%p252_p4)
}
 0x136   :  { %s256_s13 = scalar_lea.hbm %s352_s3, 16 }
 0x137   :  { %p257_p5 = scmp.ne.s32.totalorder %s352_s3, %s256_s13  ;;  %p260_p6 = scmp.lt.u32.totalorder %s256_s13, %s352_s3 }
 0x139   :  { %p262_p7 = pnand %p260_p6, %p257_p5 }
 0x13b   :  { %265 = shalt.err (!%p262_p7)
}
 0x13c   :  { %207 = dma.vmem_to_hbm [thread:$0]  %s205_s8, 16, %s352_s3, [#allocation4]  }
 0x13d   :  { %266 = dma.done.wait [#allocation4], 16  }
 0x13e   :  { %267 = vsyncadd [#allocation4], 4294967280 }
 0x13f   :  { %211 = vsyncpa [#allocation4], 1 }

</bundles_post_ra>
